<compile_context>
chip_gen: v7x
topology: tpu7x:2x2x1
jax: 0.10.0
libtpu: 0.0.40
codegen_flags: <defaults>
</compile_context>

<pallas_src>
import math
from functools import partial

import jax
import jax.numpy as jnp
from jax.experimental import pallas as pl
from jax.experimental.pallas import tpu as pltpu


def _random_layer_kernel(*refs, num_inputs, scale):
    # refs = (x_0, R_0, x_1, R_1, ..., x_{k-1}, R_{k-1}, out)
    out_ref = refs[2 * num_inputs]
    acc = None
    for idx in range(num_inputs):
        x = refs[2 * idx][...]
        r = refs[2 * idx + 1][...]
        p = jnp.dot(x, r, preferred_element_type=jnp.float32)
        acc = p if acc is None else acc * p
    out_ref[...] = (acc * scale).astype(out_ref.dtype)


def _round_up(x, m):
    return ((x + m - 1) // m) * m


def _tpu_info():
    """(physical VMEM bytes, has 2 TensorCores per chip)."""
    vmem = 128 << 20
    try:
        vmem = int(pltpu.get_tpu_info().vmem_capacity_bytes)
    except Exception:
        pass
    kind = ""
    try:
        kind = jax.devices()[0].device_kind.lower()
    except Exception:
        pass
    two_tc = "v7" in kind  # v5e / v6e are single-TensorCore chips
    return vmem, two_tc


def _choose_tiles(N, input_dims, output_dim, *, vmem_bytes, two_tc):
    """Pick (mode, tn, td, vmem_needed) from a generation-aware VMEM budget."""
    sum_d = sum(input_dims)
    budget = int(vmem_bytes * 0.55)  # leave headroom for compiler scratch

    def cap_rows(t):
        t = max(8, (min(int(t), 1024) // 8) * 8)
        if N >= 8:
            t = min(t, (N // 8) * 8)          # never tile past the batch
        if two_tc and N > 8:                  # v7x only: give both TCs a share
            t = min(t, max(8, _round_up(-(-N // 2), 8)))
        return t

    # Path A: every R_i fully VMEM resident (single-buffered, DMA'd once).
    r_resident = 4 * sum_d * output_dim
    per_row_a = 2 * 4 * (output_dim + sum_d)  # dbl-buffered out slab + x streams
    if r_resident + 8 * per_row_a <= budget:
        tn = cap_rows((budget - r_resident) // per_row_a)
        return "resident", tn, None, r_resident + tn * per_row_a

    # Path B: R too big to stay resident -> tile output_dim on an inner axis.
    if output_dim % 128 == 0 and output_dim > 128:
        td = output_dim
        while td > 128 and 2 * 4 * sum_d * td > budget // 2:
            td = max(128, ((td // 2) // 128) * 128)
        r_tiled = 2 * 4 * sum_d * td          # dbl-buffered R tiles
        per_row_b = 2 * 4 * (td + sum_d)
        if r_tiled + 8 * per_row_b <= budget:
            tn = cap_rows((budget - r_tiled) // per_row_b)
            return "tiled_out", tn, td, r_tiled + tn * per_row_b

    # TODO(synk): also tile the contraction dims d_i (with an f32 accumulator)
    # when even a single (d_i, 128) R tile cannot fit the VMEM budget.
    return "resident", 8, None, r_resident + 8 * per_row_a


def random_layer_forward(input_list, random_matrices, output_dim, *, use_bf16=False):
    """Fused Pallas forward pass for _RandomLayer."""
    k = len(input_list)
    assert k == len(random_matrices) and k >= 1
    N = int(input_list[0].shape[0])
    input_dims = [int(x.shape[1]) for x in input_list]
    for idx in range(k):
        assert input_list[idx].shape == (N, input_dims[idx])
        assert random_matrices[idx].shape == (input_dims[idx], output_dim)

    scale = 1.0 / math.pow(float(output_dim), 1.0 / k)
    sum_d = sum(input_dims)

    vmem_bytes, two_tc = _tpu_info()
    mode, tn, td, vmem_needed = _choose_tiles(
        N, input_dims, output_dim, vmem_bytes=vmem_bytes, two_tc=two_tc)

    op_dtype = jnp.bfloat16 if use_bf16 else jnp.float32

    args = []
    in_specs = []
    if mode == "resident":
        # 1-D grid over the batch; each R_i fully resident & single-buffered.
        grid = (pl.cdiv(N, tn),)
        for idx in range(k):
            d = input_dims[idx]
            in_specs.append(pl.BlockSpec((tn, d), lambda b: (b, 0)))
            in_specs.append(pl.BlockSpec((d, output_dim), lambda b: (0, 0),
                                         pipeline_mode=pl.Buffered(1)))
            args.append(input_list[idx].astype(op_dtype))
            args.append(random_matrices[idx].astype(op_dtype))
        out_spec = pl.BlockSpec((tn, output_dim), lambda b: (b, 0))
        dim_sem = ("parallel",)
    else:
        # 2-D grid: batch outer (parallel), output_dim inner. x_i blocks are
        # constant across the inner axis (DMA'd once per batch tile); R_i tiles
        # stream along output_dim.
        grid = (pl.cdiv(N, tn), pl.cdiv(output_dim, td))
        for idx in range(k):
            d = input_dims[idx]
            in_specs.append(pl.BlockSpec((tn, d), lambda b, j: (b, 0)))
            in_specs.append(pl.BlockSpec((d, td), lambda b, j: (0, j)))
            args.append(input_list[idx].astype(op_dtype))
            args.append(random_matrices[idx].astype(op_dtype))
        out_spec = pl.BlockSpec((tn, td), lambda b, j: (b, j))
        dim_sem = ("parallel", "arbitrary")

    kernel = partial(_random_layer_kernel, num_inputs=k, scale=scale)

    vmem_limit = int(min(max(vmem_needed + (8 << 20), 32 << 20),
                         max(32 << 20, int(vmem_bytes * 0.9))))

    cost = pl.CostEstimate(
        flops=2 * N * sum_d * output_dim,
        transcendentals=0,
        bytes_accessed=4 * (N * sum_d + sum_d * output_dim + N * output_dim),
    )

    out = pl.pallas_call(
        kernel,
        out_shape=jax.ShapeDtypeStruct((N, output_dim), jnp.float32),
        grid_spec=pl.GridSpec(grid=grid, in_specs=in_specs, out_specs=out_spec),
        compiler_params=pltpu.CompilerParams(
            dimension_semantics=dim_sem,
            vmem_limit_bytes=vmem_limit,
        ),
        cost_estimate=cost,
    )(*args)
    return out


def random_layer_reference(input_list, random_matrices, output_dim):
    """Plain-JAX reference mirroring the PyTorch forward (f32-accurate dots)."""
    k = len(input_list)
    proj = [jnp.dot(input_list[i], random_matrices[i],
                    precision=jax.lax.Precision.HIGHEST) for i in range(k)]
    out = proj[0] / math.pow(float(output_dim), 1.0 / k)
    for p in proj[1:]:
        out = out * p
    return out


if __name__ == "__main__":
    # Small shapes consistent with CDAN-style usage of _RandomLayer:
    # input_list = [features (N, 32), predictions (N, 8)], output_dim = 512.
    key = jax.random.PRNGKey(0)
    input_dims = [32, 8]
    output_dim = 512
    k = len(input_dims)

    mkeys = jax.random.split(key, k + 1)
    # Deterministic "parameters": random_matrix[i] ~ N(0,1), shape (d_i, output_dim)
    random_matrices = [
        jax.random.normal(mkeys[i], (input_dims[i], output_dim), dtype=jnp.float32)
        for i in range(k)
    ]

    # Case N=8: single full tile.  Case N=20: ragged last tile (checks that the
    # masked partial output block cannot be poisoned by garbage input rows).
    for case, N in enumerate((8, 20)):
        xkeys = jax.random.split(jax.random.fold_in(mkeys[-1], case), k)
        input_list = [
            jax.random.normal(xkeys[i], (N, input_dims[i]), dtype=jnp.float32)
            for i in range(k)
        ]

        out = random_layer_forward(input_list, random_matrices, output_dim)
        out = jax.block_until_ready(out)

        ref = random_layer_reference(input_list, random_matrices, output_dim)
        assert out.shape == (N, output_dim)
        assert jnp.allclose(out, ref, rtol=1e-3, atol=1e-3), f"mismatch (N={N})"

    print("KERNEL_OK")
</pallas_src>

<mosaic_0001>
module attributes {stable_mosaic.version = 11 : i64} {
  func.func @_random_layer_kernel(%arg0: i32, %arg1: memref<8x32xf32, #tpu.memory_space<vmem>>, %arg2: memref<32x512xf32, #tpu.memory_space<vmem>>, %arg3: memref<8x8xf32, #tpu.memory_space<vmem>>, %arg4: memref<8x512xf32, #tpu.memory_space<vmem>>, %arg5: memref<8x512xf32, #tpu.memory_space<vmem>>) attributes {dimension_semantics = [#tpu.dimension_semantics<parallel>], iteration_bounds = array<i64: 1>, scalar_prefetch = 0 : i64, scratch_operands = 0 : i64, tpu.core_type = #tpu.core_type<tc>, window_params = [{transform_indices = @transform_0, window_bounds = array<i64: 8, 32>}, {pipeline_mode = #tpu.pipeline_mode<synchronous>, transform_indices = @transform_1, window_bounds = array<i64: 32, 512>}, {transform_indices = @transform_2, window_bounds = array<i64: 8, 8>}, {pipeline_mode = #tpu.pipeline_mode<synchronous>, transform_indices = @transform_3, window_bounds = array<i64: 8, 512>}, {transform_indices = @transform_4, window_bounds = array<i64: 8, 512>}]} {
    %c0 = arith.constant 0 : index
    %c0_0 = arith.constant 0 : index
    %0 = vector.load %arg1[%c0, %c0_0] : memref<8x32xf32, #tpu.memory_space<vmem>>, vector<8x32xf32>
    %c0_1 = arith.constant 0 : index
    %c0_2 = arith.constant 0 : index
    %1 = vector.load %arg2[%c0_1, %c0_2] : memref<32x512xf32, #tpu.memory_space<vmem>>, vector<32x512xf32>
    %cst = arith.constant dense<0.000000e+00> : vector<8x512xf32>
    %2 = tpu.matmul %0, %1, %cst {dimension_numbers = #tpu.dot_dimension_numbers<[1], [0], [0], [1], [0, 0, 1, 1], [], []>} : vector<8x32xf32>, vector<32x512xf32>, vector<8x512xf32> -> vector<8x512xf32>
    %c0_3 = arith.constant 0 : index
    %c0_4 = arith.constant 0 : index
    %3 = vector.load %arg3[%c0_3, %c0_4] : memref<8x8xf32, #tpu.memory_space<vmem>>, vector<8x8xf32>
    %c0_5 = arith.constant 0 : index
    %c0_6 = arith.constant 0 : index
    %4 = vector.load %arg4[%c0_5, %c0_6] : memref<8x512xf32, #tpu.memory_space<vmem>>, vector<8x512xf32>
    %cst_7 = arith.constant dense<0.000000e+00> : vector<8x512xf32>
    %5 = tpu.matmul %3, %4, %cst_7 {dimension_numbers = #tpu.dot_dimension_numbers<[1], [0], [0], [1], [0, 0, 1, 1], [], []>} : vector<8x8xf32>, vector<8x512xf32>, vector<8x512xf32> -> vector<8x512xf32>
    %6 = arith.mulf %2, %5 : vector<8x512xf32>
    %cst_8 = arith.constant 0.0441941731 : f32
    %7 = vector.broadcast %cst_8 : f32 to vector<8x512xf32>
    %8 = arith.mulf %6, %7 : vector<8x512xf32>
    %c0_9 = arith.constant 0 : index
    %c0_10 = arith.constant 0 : index
    %9 = vector.load %arg5[%c0_9, %c0_10] : memref<8x512xf32, #tpu.memory_space<vmem>>, vector<8x512xf32>
    tpu.vector_store %arg5[%c0_9, %c0_10], %8 {strides = array<i32>} : memref<8x512xf32, #tpu.memory_space<vmem>>, vector<8x512xf32>,
    return
  }
  func.func @transform_0(%arg0: i32) -> (i32, i32) {
    %c0_i32 = arith.constant 0 : i32
    %c0_i32_0 = arith.constant 0 : i32
    return %arg0, %c0_i32 : i32, i32
  }
  func.func @transform_1(%arg0: i32) -> (i32, i32) {
    %c0_i32 = arith.constant 0 : i32
    %c0_i32_0 = arith.constant 0 : i32
    %c0_i32_1 = arith.constant 0 : i32
    return %c0_i32, %c0_i32_0 : i32, i32
  }
  func.func @transform_2(%arg0: i32) -> (i32, i32) {
    %c0_i32 = arith.constant 0 : i32
    %c0_i32_0 = arith.constant 0 : i32
    return %arg0, %c0_i32 : i32, i32
  }
  func.func @transform_3(%arg0: i32) -> (i32, i32) {
    %c0_i32 = arith.constant 0 : i32
    %c0_i32_0 = arith.constant 0 : i32
    %c0_i32_1 = arith.constant 0 : i32
    return %c0_i32, %c0_i32_0 : i32, i32
  }
  func.func @transform_4(%arg0: i32) -> (i32, i32) {
    %c0_i32 = arith.constant 0 : i32
    %c0_i32_0 = arith.constant 0 : i32
    return %arg0, %c0_i32 : i32, i32
  }
}

</mosaic_0001>

<bundles_post_ra>
// kernel: tpu_custom_call.1
= control target key start
LH: loop header
LB: loop body
LE: loop exit
PB: predicated region body
PF: predicated region fallthrough
CT: control target
= control target key end

     0   :  { %9 = vsyncpa [#allocation3], 0  ;;  %s649_s0 = inlined_call_operand.hbm [shape: f32[8,32], index: 0, kind: input, shape index: {}]   ;;  %s650_s1 = inlined_call_operand.hbm [shape: f32[32,512], index: 1, kind: input, shape index: {}]   ;;  %s651_s2 = inlined_call_operand.hbm [shape: f32[8,8], index: 2, kind: input, shape index: {}]   ;;  %s652_s3 = inlined_call_operand.hbm [shape: f32[8,512], index: 3, kind: input, shape index: {}]   ;;  %s653_s4 = inlined_call_operand.hbm [shape: f32[8,512], index: 4, kind: output, shape index: {}]  }
   0x1   :  { %10 = vsyncpa [#allocation6], 0 }
   0x2   :  { %11 = vsyncpa [#allocation9], 0 }
   0x3   :  { %12 = vsyncpa [#allocation4], 0  ;;  %s556_s15 = smov [#allocation5]   ;;  %s438_s19 = scalar_lea.hbm %s650_s1, 2048 }
   0x4   :  { %s28_s16 = sshll.u32 %s556_s15, 4  ;;  %p439_p0 = scmp.ne.s32.totalorder %s650_s1, %s438_s19  ;;  %s29_s16 = int_to_ptr.vmem [resolvable:$true] %s28_s16 }
   0x5   :  { %p442_p1 = scmp.lt.u32.totalorder %s438_s19, %s650_s1 }
   0x7   :  { %p444_p2 = pnand %p442_p1, %p439_p0 }
   0x9   :  { %447 = shalt.err (!%p444_p2)
}
   0xa   :  { %s448_s24 = scalar_lea.vmem %s29_s16, 2048  ;;  %p453_p4 = scmp.lt.s32.totalorder %s29_s16, %s29_s16 }
   0xb   :  { %p449_p3 = scmp.ne.s32.totalorder %s29_s16, %s448_s24  ;;  %p454_p5 = scmp.lt.s32.totalorder %s448_s24, %s448_s24 }
   0xd   :  { %p455_p6 = por %p454_p5, %p453_p4 }
   0xf   :  { %p456_p7 = pnand %p455_p6, %p449_p3 }
  0x11   :  { %459 = shalt.err (!%p456_p7)
}
  0x12   :  { %s557_s25 = smov 512   ;;  %s558_s26 = smov 32  }
  0x13   :  { %34 = dma.hbm_to_vmem [thread:$0]  %s650_s1, 2048, %s29_s16, [#allocation6], %s557_s25, %s557_s25, %s558_s26  }
  0x14   :  { %s559_s29 = smov [#allocation2]   ;;  %s560_s5 = smov [#allocation7]  }
  0x15   :  { %s19_s30 = sshll.u32 %s559_s29, 4  ;;  %s41_s6 = sshll.u32 %s560_s5, 4  ;;  %s20_s30 = int_to_ptr.vmem [resolvable:$true] %s19_s30  ;;  %s42_s6 = int_to_ptr.vmem [resolvable:$true] %s41_s6 }
  0x16   :  { %s460_s9 = scalar_lea.hbm %s649_s0, 128 }
  0x17   :  { %p461_p8 = scmp.ne.s32.totalorder %s649_s0, %s460_s9  ;;  %p464_p9 = scmp.lt.u32.totalorder %s460_s9, %s649_s0 }
  0x19   :  { %p466_p10 = pnand %p464_p9, %p461_p8 }
  0x1b   :  { %469 = shalt.err (!%p466_p10)
}
  0x1c   :  { %s470_s1 = scalar_lea.vmem %s20_s30, 128  ;;  %p475_p12 = scmp.lt.s32.totalorder %s20_s30, %s20_s30 }
  0x1d   :  { %p471_p11 = scmp.ne.s32.totalorder %s20_s30, %s470_s1  ;;  %p476_p13 = scmp.lt.s32.totalorder %s470_s1, %s470_s1 }
  0x1f   :  { %p477_p0 = por %p476_p13, %p475_p12 }
  0x21   :  { %p478_p1 = pnand %p477_p0, %p471_p11 }
  0x23   :  { %481 = shalt.err (!%p478_p1)
}
  0x24   :  { %22 = dma.hbm_to_vmem [thread:$0]  %s649_s0, 128, %s20_s30, [#allocation3]  }
  0x25   :  { %s482_s18 = scalar_lea.hbm %s651_s2, 128 }
  0x26   :  { %p483_p2 = scmp.ne.s32.totalorder %s651_s2, %s482_s18  ;;  %p486_p3 = scmp.lt.u32.totalorder %s482_s18, %s651_s2 }
  0x28   :  { %p488_p4 = pnand %p486_p3, %p483_p2 }
  0x2a   :  { %491 = shalt.err (!%p488_p4)
}
  0x2b   :  { %s492_s23 = scalar_lea.vmem %s42_s6, 128  ;;  %p497_p6 = scmp.lt.s32.totalorder %s42_s6, %s42_s6 }
  0x2c   :  { %p493_p5 = scmp.ne.s32.totalorder %s42_s6, %s492_s23  ;;  %p498_p7 = scmp.lt.s32.totalorder %s492_s23, %s492_s23 }
  0x2e   :  { %p499_p8 = por %p498_p7, %p497_p6 }
  0x30   :  { %p500_p9 = pnand %p499_p8, %p493_p5 }
  0x32   :  { %503 = shalt.err (!%p500_p9)
}
  0x33   :  { %44 = dma.hbm_to_vmem [thread:$0]  %s651_s2, 128, %s42_s6, [#allocation6]  }
  0x34   :  { %s561_s25 = smov [#allocation8]   ;;  %s504_s29 = scalar_lea.hbm %s652_s3, 512 }
  0x35   :  { %s51_s26 = sshll.u32 %s561_s25, 4  ;;  %p505_p10 = scmp.ne.s32.totalorder %s652_s3, %s504_s29  ;;  %s52_s26 = int_to_ptr.vmem [resolvable:$true] %s51_s26 }
  0x36   :  { %p508_p11 = scmp.lt.u32.totalorder %s504_s29, %s652_s3 }
  0x38   :  { %p510_p12 = pnand %p508_p11, %p505_p10 }
  0x3a   :  { %513 = shalt.err (!%p510_p12)
}
  0x3b   :  { %s514_s9 = scalar_lea.vmem %s52_s26, 512  ;;  %p519_p0 = scmp.lt.s32.totalorder %s52_s26, %s52_s26 }
  0x3c   :  { %p515_p13 = scmp.ne.s32.totalorder %s52_s26, %s514_s9  ;;  %p520_p1 = scmp.lt.s32.totalorder %s514_s9, %s514_s9 }
  0x3e   :  { %p521_p2 = por %p520_p1, %p519_p0 }
  0x40   :  { %p522_p3 = pnand %p521_p2, %p515_p13 }
  0x42   :  { %525 = shalt.err (!%p522_p3)
}
  0x43   :  { %54 = dma.hbm_to_vmem [thread:$0]  %s652_s3, 512, %s52_s26, [#allocation9]  }
  0x44   :  { %548 = dma.done.wait [#allocation3], 128  }
  0x45   :  { %549 = vsyncadd [#allocation3], 4294967168 }
  0x46   :  { %550 = dma.done.wait [#allocation6], 2176  }
  0x47   :  { %551 = vsyncadd [#allocation6], 4294965120 }
  0x48   :  { %552 = dma.done.wait [#allocation9], 512  }
  0x49   :  { %553 = vsyncadd [#allocation9], 4294966784  ;;  %v562_v0 = vmov 0.0   ;;  %v69_v1 = vld [vmem:[#allocation5 + $0x8] sm:$0xff]  ;;  %v71_v3 = vld [vmem:[#allocation5 + $0x18] sm:$0xff]  ;;  %vm84_vm0 = vcmask 261120  }
  0x4a   :  { %152 = vmatprep.mubr.f32.mxu0 %v562_v0  ;;  %223 = vmatprep.mubr.f32.mxu1 %v562_v0  ;;  %v73_v2 = vld [vmem:[#allocation5 + $0x28] sm:$0xff]  ;;  %v75_v5 = vld [vmem:[#allocation5 + $0x38] sm:$0xff]  ;;  %v68_v6 = vld [vmem:[#allocation5] sm:$0xff]  ;;  %vm235_vm1 = vcmask 64512   ;;  %s563_s3 = smov [#allocation10]  }
  0x4b   :  { %v414_v4 = vpack.c.bf16 %v73_v2, %v69_v1  ;;  %v72_v7 = vld [vmem:[#allocation5 + $0x20] sm:$0xff]  ;;  %v422_v8 = vpack.c.bf16 %v75_v5, %v71_v3  ;;  %v70_v10 = vld [vmem:[#allocation5 + $0x10] sm:$0xff]  ;;  %v77_v12 = vld [vmem:[#allocation5 + $0x48] sm:$0xff]  ;;  %s399_s10 = sshll.u32 %s563_s3, 4  ;;  %s400_s10 = int_to_ptr.vmem [resolvable:$true] %s399_s10 }
  0x4c   :  { %v416_v9 = vpack.c.bf16 %v72_v7, %v68_v6  ;;  %v74_v11 = vld [vmem:[#allocation5 + $0x30] sm:$0xff]  ;;  %v81_v14 = vld [vmem:[#allocation5 + $0x68] sm:$0xff]  ;;  %v79_v15 = vld [vmem:[#allocation5 + $0x58] sm:$0xff]  ;;  %s526_s11 = scalar_lea.vmem %s400_s10, 512  ;;  %p531_p5 = scmp.lt.s32.totalorder %s400_s10, %s400_s10 }
  0x4d   :  { %415 = vmatprep.subr.bf16.mxu0 %v414_v4  ;;  %v424_v13 = vpack.c.bf16 %v74_v11, %v70_v10  ;;  %v83_v16 = vld [vmem:[#allocation5 + $0x78] sm:$0xff]  ;;  %423 = vmatprep.subr.bf16.mxu1 %v422_v8  ;;  %v418_v17 = vpack.c.bf16 %v81_v14, %v77_v12  ;;  %v76_v19 = vld [vmem:[#allocation5 + $0x40] sm:$0xff]  ;;  %v78_v21 = vld [vmem:[#allocation5 + $0x50] sm:$0xff]  ;;  %p527_p4 = scmp.ne.s32.totalorder %s400_s10, %s526_s11  ;;  %p532_p6 = scmp.lt.s32.totalorder %s526_s11, %s526_s11 }
  0x4e   :  { %417 = vmatpush1.bf16.msra.mxu0 %v416_v9  ;;  %v426_v18 = vpack.c.bf16 %v83_v16, %v79_v15  ;;  %v80_v20 = vld [vmem:[#allocation5 + $0x60] sm:$0xff]  ;;  %v82_v23 = vld [vmem:[#allocation5 + $0x70] sm:$0xff]  ;;  %v67_v27 = vld [vmem:[#allocation2] sm:$0xff] }
  0x4f   :  { %425 = vmatpush1.bf16.msra.mxu1 %v424_v13  ;;  %v420_v22 = vpack.c.bf16 %v80_v20, %v76_v19  ;;  %419 = vmatprep.subr.bf16.mxu0 %v418_v17  ;;  %v428_v24 = vpack.c.bf16 %v82_v23, %v78_v21  ;;  %v232_v25 = vld [vmem:[#allocation8 + $0x8] sm:$0xff]  ;;  %v234_v26 = vld [vmem:[#allocation8 + $0x18] sm:$0xff]  ;;  %v231_v28 = vld [vmem:[#allocation8] sm:$0xff]  ;;  %p533_p7 = por %p532_p6, %p531_p5 }
  0x50   :  { %427 = vmatprep.subr.bf16.mxu1 %v426_v18  ;;  %v233_v29 = vld [vmem:[#allocation8 + $0x10] sm:$0xff]  ;;  %v230_v30 = vld [vmem:[#allocation7] sm:$0xff] }
  0x51   :  { %p534_p8 = pnand %p533_p7, %p527_p4 }
  0x52   :  { %421 = vmatpush1.bf16.msra.mxu0 %v420_v22 }
  0x53   :  { %429 = vmatpush1.bf16.msra.mxu1 %v428_v24  ;;  %239 = vmatprep.subr.mxu0 %v232_v25 }
  0x54   :  { %310 = vmatprep.subr.mxu1 %v234_v26 }
  0x55   :  { %410 = vmatmul.mubr.msk.f32.vlgmr.msra.gmra.mrb[0].mxu0 %vm84_vm0, %v67_v27 }
  0x56   :  { %411 = vmatmul.mubr.msk.f32.vlgmr.msra.gmra.mrb[0].mxu1 %vm84_vm0, %v67_v27  ;;  %240 = vmatpush1.msra.mxu0 %v231_v28 }
  0x57   :  { %311 = vmatpush1.msra.mxu1 %v233_v29  ;;  %303 = vmatprep.mubr.f32.mxu0 %v562_v0 }
  0x58   :  { %374 = vmatprep.mubr.f32.mxu1 %v562_v0 }
  0x59   :  { %412 = vmatmul.mubr.msk.f32.vlgmr.msra.gmra.mrb[2].mxu0 %vm235_vm1, %v230_v30 }
  0x5a   :  { %413 = vmatmul.mubr.msk.f32.vlgmr.msra.gmra.mrb[2].mxu1 %vm235_vm1, %v230_v30 }
 0x128   :  { %v154_v31 = vpop.f32.mrb[0].mxu0 }
 0x129   :  { %v225_v32 = vpop.f32.mrb[0].mxu1  ;;  %v156_v33 = vpop.f32.mrb[1].mxu0 }
 0x12a   :  { %v227_v34 = vpop.f32.mrb[1].mxu1 }
 0x12c   :  { %v305_v35 = vpop.f32.mrb[2].mxu0 }
 0x12d   :  { %v381_v36 = vmul.f32 %v305_v35, %v154_v31  ;;  %v376_v37 = vpop.f32.mrb[2].mxu1  ;;  %v307_v38 = vpop.f32.mrb[3].mxu0 }
 0x12e   :  { %v383_v39 = vmul.f32 %v376_v37, %v225_v32  ;;  %v382_v40 = vmul.f32 %v307_v38, %v156_v33  ;;  %v378_v41 = vpop.f32.mrb[3].mxu1 }
 0x12f   :  { %v385_v42 = vmul.f32 0.044194173, %v381_v36  ;;  %v384_v43 = vmul.f32 %v378_v41, %v227_v34 }
 0x130   :  { %v387_v44 = vmul.f32 0.044194173, %v383_v39  ;;  %v386_v45 = vmul.f32 0.044194173, %v382_v40 }
 0x131   :  { %389 = vst [vmem:[#allocation10] sm:$0xff] %v385_v42  ;;  %v388_v46 = vmul.f32 0.044194173, %v384_v43 }
 0x132   :  { %391 = vst [vmem:[#allocation10 + $0x10] sm:$0xff] %v387_v44  ;;  %390 = vst [vmem:[#allocation10 + $0x8] sm:$0xff] %v386_v45 }
 0x133   :  { %392 = vst [vmem:[#allocation10 + $0x18] sm:$0xff] %v388_v46 }
 0x134   :  { %537 = shalt.err (!%p534_p8)
}
 0x135   :  { %s538_s1 = scalar_lea.hbm %s653_s4, 512 }
 0x136   :  { %p539_p9 = scmp.ne.s32.totalorder %s653_s4, %s538_s1  ;;  %p542_p10 = scmp.lt.u32.totalorder %s538_s1, %s653_s4 }
 0x138   :  { %p544_p11 = pnand %p542_p10, %p539_p9 }
 0x13a   :  { %547 = shalt.err (!%p544_p11)
}
 0x13b   :  { %402 = dma.vmem_to_hbm [thread:$0]  %s400_s10, 512, %s653_s4, [#allocation4]  }
 0x13c   :  { %554 = dma.done.wait [#allocation4], 512  }
 0x13d   :  { %555 = vsyncadd [#allocation4], 4294966784 }
 0x13e   :  { %406 = vsyncpa [#allocation3], 1 }
 0x13f   :  { %407 = vsyncpa [#allocation6], 1 }
 0x140   :  { %408 = vsyncpa [#allocation9], 1 }
 0x141   :  { %409 = vsyncpa [#allocation4], 1 }

</bundles_post_ra>
